<compile_context>
chip_gen: v6e
topology: v6e:2x2x1
jax: 0.10.0
libtpu: 0.0.40
codegen_flags: <defaults>
</compile_context>

<pallas_src>
import functools

import jax
import jax.numpy as jnp
from jax import lax
from jax.experimental import pallas as pl
from jax.experimental.pallas import tpu as pltpu


# ----------------------------- small helpers --------------------------------

def _cdiv(a, b):
    return -(-a // b)


def _round_up(v, m):
    return _cdiv(v, m) * m


def _align_down(v, m):
    return (v // m) * m if v >= m else v


def _sublane_pack(dtype):
    """Sublane packing factor: 8 for f32, 16 for bf16, 32 for int8/fp8."""
    return 8 * max(1, 4 // jnp.dtype(dtype).itemsize)


def _device_vmem_capacity_bytes():
    try:
        return int(pltpu.get_tpu_info().vmem_capacity_bytes)
    except Exception:
        return 64 * 1024 * 1024  # v7x size; safe lower bound across generations


_TARGET_BLOCK_BYTES = 4 * 1024 * 1024  # ~4 MiB input blocks (HBM-roofline sweet spot)


# ------------------------------ flat path ------------------------------------
# Layout: (N*C, H*W) — each spatial plane is one dense lane row, no wrapper
# transpose. Separable 2x2 max via flat-index shifts (+1 and +W).

def _shift_flat(x, delta, hw, use_roll):
    """y[:, f] = x[:, (f + delta) % hw]; wrapped entries are masked by caller."""
    if use_roll:
        # pltpu.roll has jnp.roll semantics (result[i] = x[(i - shift) % n]);
        # shift = hw - delta is a left shift by delta.
        return pltpu.roll(x, shift=hw - delta, axis=1)
    # TODO(synk): benchmark pltpu.roll on non-128-multiple lane extents and
    # drop this concatenate fallback if the roll lowers efficiently there.
    return jnp.concatenate([x[:, delta:], x[:, :delta]], axis=1)


def _maxpool_flat_kernel(x_ref, o_ref, *, h, w, use_roll):
    x = x_ref[...]                                      # (TC, H*W), lane-dense
    hw = h * w
    # Edge masks from a single (1, hw) row; jnp.where broadcasts over planes.
    flat = lax.broadcasted_iota(jnp.int32, (1, hw), 1)
    last_col = (flat % w) == (w - 1)                    # replicate right edge
    last_row = flat >= (hw - w)                         # replicate bottom edge

    # Horizontal pass: max(x[h, w], x[h, min(w+1, W-1)])
    x_r = jnp.where(last_col, x, _shift_flat(x, 1, hw, use_roll))
    row = jnp.maximum(x, x_r)
    # Vertical pass: max(row[h, w], row[min(h+1, H-1), w]) (+W in flat index)
    row_d = jnp.where(last_row, row, _shift_flat(row, w, hw, use_roll))
    o_ref[...] = jnp.maximum(row, row_d)


def _choose_block_planes(nc, hw, dtype):
    """Planes (TC) per grid step: ~4 MiB blocks, sublane-packing aligned,
    preferring an even number of grid steps so both v7x TensorCores get work."""
    dtype_bytes = jnp.dtype(dtype).itemsize
    pack = _sublane_pack(dtype)
    plane_bytes = _round_up(hw, 128) * dtype_bytes
    tc = int(max(1, min(nc, _TARGET_BLOCK_BYTES // plane_bytes)))
    tc = _align_down(tc, pack)
    steps = _cdiv(nc, tc)
    if steps == 1:
        if nc >= 2 * pack:                       # enough work: split for 2 TCs
            tc = max(pack, _align_down(_cdiv(nc, 2), pack))
    elif steps % 2 == 1:
        alt = max(1, _cdiv(nc, steps + 1))
        alt = _align_down(alt, pack)
        if alt >= 1 and _cdiv(nc, alt) % 2 == 0:
            tc = alt
    return int(max(1, min(tc, nc)))


def _maxpool_flat(x, vmem_cap):
    N, C, H, W = x.shape
    nc, hw = N * C, H * W
    dtype_bytes = jnp.dtype(x.dtype).itemsize
    x2 = x.reshape(nc, hw)                              # free row-major reshape

    tc = _choose_block_planes(nc, hw, x.dtype)
    grid = (_cdiv(nc, tc),)
    use_roll = (hw % 128) == 0                          # dense XLU lane-roll path

    block_bytes = _round_up(tc, _sublane_pack(x.dtype)) * _round_up(hw, 128) * dtype_bytes
    # in + out, double-buffered, plus headroom for in-kernel temporaries;
    # clamped to 3/4 of the device's physical VMEM (v7x: 64 MiB -> 48 MiB).
    # TODO(synk): huge planes with no valid halo tiling (see below) can still
    # exceed this clamp; pad H in the wrapper to unlock halo tiling for them.
    vmem_limit = int(min(max(6 * block_bytes, 32 * 1024 * 1024), (vmem_cap * 3) // 4))

    kernel = functools.partial(_maxpool_flat_kernel, h=H, w=W, use_roll=use_roll)
    out2 = pl.pallas_call(
        kernel,
        out_shape=jax.ShapeDtypeStruct((nc, hw), x.dtype),
        grid=grid,
        in_specs=[pl.BlockSpec((tc, hw), lambda i: (i, 0))],
        out_specs=pl.BlockSpec((tc, hw), lambda i: (i, 0)),
        compiler_params=pltpu.CompilerParams(
            dimension_semantics=("parallel",),
            vmem_limit_bytes=vmem_limit,
        ),
        cost_estimate=pl.CostEstimate(
            flops=4 * nc * hw,                           # 3 maxes + selects / elem
            transcendentals=0,
            bytes_accessed=2 * nc * hw * dtype_bytes,    # read + write, mem-bound
        ),
    )(x2)
    return out2.reshape(N, C, H, W)


# --------------------------- halo-tiled path ---------------------------------
# For planes too big to hold whole in VMEM: layout (nc, H, W), grid over
# (plane, row-tile). Each step reads its (1, th, W) tile plus an 8-row halo
# block whose first row is the next tile's first row (clamped at the bottom).

def _maxpool_halo_kernel(x_ref, halo_ref, o_ref, *, w, th, use_roll):
    x = x_ref[...]                                      # (1, th, W)
    lane = lax.broadcasted_iota(jnp.int32, (1, 1, w), 2)
    last_col = lane == (w - 1)

    def hpool(v):                                       # horizontal 2-max, replicate right
        if use_roll:
            v_r = pltpu.roll(v, shift=w - 1, axis=2)    # v_r[..., j] = v[..., (j+1) % w]
        else:
            v_r = jnp.concatenate([v[:, :, 1:], v[:, :, :1]], axis=2)
        return jnp.maximum(v, jnp.where(last_col, v, v_r))

    row = hpool(x)                                      # (1, th, W)
    # Halo: first row below this tile, horizontally pooled; bottom tile
    # replicates its own (pooled) last row instead.
    hrow = hpool(halo_ref[:, 0:1, :])                   # (1, 1, W)
    is_last_tile = pl.program_id(1) == pl.num_programs(1) - 1
    hrow = jnp.where(is_last_tile, row[:, th - 1:th, :], hrow)

    # Vertical pass: shift rows up by one inside the tile (sublane roll),
    # feed the halo row into the tile's last row.
    row_d = pltpu.roll(row, shift=th - 1, axis=1)       # row_d[:, i] = row[:, (i+1) % th]
    sub = lax.broadcasted_iota(jnp.int32, (1, th, 1), 1)
    row_d = jnp.where(sub == (th - 1), hrow, row_d)
    o_ref[...] = jnp.maximum(row, row_d)


def _choose_halo_rows(h, w, dtype_bytes, target_bytes):
    """Rows per tile: a divisor of H, multiple of 8, tile ~= target_bytes."""
    w_pad = _round_up(w, 128)
    max_rows = max(8, target_bytes // (w_pad * dtype_bytes))
    best = None
    for th in range(8, h, 8):                           # th < H => >= 2 tiles
        if h % th == 0 and th <= max_rows:
            best = th
    return best


def _maxpool_halo(x, th, vmem_cap):
    N, C, H, W = x.shape
    nc = N * C
    dtype_bytes = jnp.dtype(x.dtype).itemsize
    x3 = x.reshape(nc, H, W)
    num_tiles = H // th
    halo_rows = 8                                       # second-minor must be a multiple of 8

    w_pad = _round_up(W, 128)
    block_bytes = th * w_pad * dtype_bytes
    vmem_limit = int(min(max(8 * block_bytes, 32 * 1024 * 1024), (vmem_cap * 3) // 4))
    use_roll = (W % 128) == 0

    halo_blocks = H // halo_rows
    kernel = functools.partial(_maxpool_halo_kernel, w=W, th=th, use_roll=use_roll)
    out3 = pl.pallas_call(
        kernel,
        out_shape=jax.ShapeDtypeStruct((nc, H, W), x.dtype),
        grid=(nc, num_tiles),
        in_specs=[
            pl.BlockSpec((1, th, W), lambda i, r: (i, r, 0)),
            # Halo: 8-row block starting at the next tile's first row,
            # clamped to the last 8 rows at the bottom (content unused there).
            pl.BlockSpec(
                (1, halo_rows, W),
                lambda i, r: (i, jnp.minimum((r + 1) * (th // halo_rows),
                                             halo_blocks - 1), 0)),
        ],
        out_specs=pl.BlockSpec((1, th, W), lambda i, r: (i, r, 0)),
        compiler_params=pltpu.CompilerParams(
            dimension_semantics=("parallel", "parallel"),
            vmem_limit_bytes=vmem_limit,
        ),
        cost_estimate=pl.CostEstimate(
            flops=4 * nc * H * W,
            transcendentals=0,
            bytes_accessed=2 * nc * H * W * dtype_bytes,
        ),
    )(x3, x3)
    return out3.reshape(N, C, H, W)


# ------------------------------ public entry ---------------------------------

def maxpool_stride1(x, *, halo_threshold_bytes=_TARGET_BLOCK_BYTES):
    """x: (N, C, H, W) -> (N, C, H, W); 2x2 max pool, stride 1, replicate pad."""
    N, C, H, W = x.shape
    dtype_bytes = jnp.dtype(x.dtype).itemsize
    plane_bytes = _round_up(H * W, 128) * dtype_bytes
    vmem_cap = _device_vmem_capacity_bytes()

    if plane_bytes > halo_threshold_bytes and H >= 16:
        th = _choose_halo_rows(H, W, dtype_bytes, halo_threshold_bytes)
        if th is not None:
            return _maxpool_halo(x, th=th, vmem_cap=vmem_cap)
        # TODO(synk): pad H (replicate) for awkward heights (no 8-multiple
        # divisor) so huge planes can also take the halo-tiled path.
    return _maxpool_flat(x, vmem_cap=vmem_cap)


# ------------------------------- reference -----------------------------------

def _reference(x):
    # Pure-JAX reference mirroring F.pad(..., mode='replicate') + max_pool2d(2, 1)
    x_pad = jnp.pad(x, ((0, 0), (0, 0), (0, 1), (0, 1)), mode="edge")
    a = x_pad[:, :, :-1, :-1]
    b = x_pad[:, :, :-1, 1:]
    c = x_pad[:, :, 1:, :-1]
    d = x_pad[:, :, 1:, 1:]
    return jnp.maximum(jnp.maximum(a, b), jnp.maximum(c, d))


if __name__ == "__main__":
    key = jax.random.PRNGKey(0)
    k1, k2, k3, k4 = jax.random.split(key, 4)

    # 1) Main shape: lane-dense flat path with XLU lane roll (H*W % 128 == 0).
    x = jax.random.normal(k1, (2, 4, 16, 16), dtype=jnp.float32)
    out = jax.block_until_ready(maxpool_stride1(x))
    assert out.shape == x.shape
    assert jnp.allclose(out, _reference(x)), "flat/roll path mismatch"

    # 2) H*W not a multiple of 128 (e.g. darknet 14x14 heads): fallback shift.
    x14 = jax.random.normal(k2, (2, 3, 14, 14), dtype=jnp.float32)
    out14 = jax.block_until_ready(maxpool_stride1(x14))
    assert jnp.allclose(out14, _reference(x14)), "flat/unaligned path mismatch"

    # 3) bf16 (sub-32-bit sublane packing); max pooling is exact in bf16.
    xb = jax.random.normal(k3, (1, 4, 16, 16), dtype=jnp.bfloat16)
    outb = jax.block_until_ready(maxpool_stride1(xb))
    assert jnp.array_equal(outb, _reference(xb)), "bf16 path mismatch"

    # 4) Halo-tiled large-plane path, forced via a tiny threshold.
    xh = jax.random.normal(k4, (1, 2, 32, 128), dtype=jnp.float32)
    outh = jax.block_until_ready(maxpool_stride1(xh, halo_threshold_bytes=1024))
    assert jnp.allclose(outh, _reference(xh)), "halo path mismatch"

    print("KERNEL_OK")
</pallas_src>

<mosaic_0001>
module attributes {stable_mosaic.version = 11 : i64} {
  func.func @_maxpool_flat_kernel(%arg0: i32, %arg1: memref<8x256xf32, #tpu.memory_space<vmem>>, %arg2: memref<8x256xf32, #tpu.memory_space<vmem>>) attributes {dimension_semantics = [#tpu.dimension_semantics<parallel>], iteration_bounds = array<i64: 1>, scalar_prefetch = 0 : i64, scratch_operands = 0 : i64, tpu.core_type = #tpu.core_type<tc>, window_params = [{transform_indices = @transform_0, window_bounds = array<i64: 8, 256>}, {transform_indices = @transform_1, window_bounds = array<i64: 8, 256>}]} {
    %c0 = arith.constant 0 : index
    %c0_0 = arith.constant 0 : index
    %0 = vector.load %arg1[%c0, %c0_0] : memref<8x256xf32, #tpu.memory_space<vmem>>, vector<8x256xf32>
    %1 = tpu.iota {dimensions = array<i32: 1>} : vector<1x256xi32>
    %c16_i32 = arith.constant 16 : i32
    %c0_i32 = arith.constant 0 : i32
    %2 = arith.cmpi eq, %c16_i32, %c0_i32 : i32
    %c1_i32 = arith.constant 1 : i32
    %3 = arith.select %2, %c1_i32, %c16_i32 : i32
    %4 = vector.broadcast %3 : i32 to vector<1x256xi32>
    %5 = arith.remsi %1, %4 : vector<1x256xi32>
    %c0_i32_1 = arith.constant 0 : i32
    %6 = vector.broadcast %c0_i32_1 : i32 to vector<1x256xi32>
    %7 = arith.cmpi ne, %5, %6 : vector<1x256xi32>
    %c0_i32_2 = arith.constant 0 : i32
    %8 = vector.broadcast %c0_i32_2 : i32 to vector<1x256xi32>
    %9 = arith.cmpi slt, %5, %8 : vector<1x256xi32>
    %c0_i32_3 = arith.constant 0 : i32
    %10 = arith.cmpi slt, %3, %c0_i32_3 : i32
    %11 = vector.broadcast %10 : i1 to vector<1x256xi1>
    %12 = vector.broadcast %11 : vector<1x256xi1> to vector<1x256xi1>
    %13 = arith.xori %9, %12 : vector<1x256xi1>
    %14 = arith.andi %13, %7 : vector<1x256xi1>
    %15 = vector.broadcast %3 : i32 to vector<1x256xi32>
    %16 = arith.addi %5, %15 : vector<1x256xi32>
    %17 = arith.select %14, %16, %5 : vector<1x256xi1>, vector<1x256xi32>
    %c15_i32 = arith.constant 15 : i32
    %18 = vector.broadcast %c15_i32 : i32 to vector<1x256xi32>
    %19 = arith.cmpi eq, %17, %18 : vector<1x256xi32>
    %c240_i32 = arith.constant 240 : i32
    %20 = vector.broadcast %c240_i32 : i32 to vector<1x256xi32>
    %21 = arith.cmpi sge, %1, %20 : vector<1x256xi32>
    %c255_i32 = arith.constant 255 : i32
    %22 = tpu.dynamic_rotate %0 by %c255_i32 dim 1 : vector<8x256xf32>, i32 -> vector<8x256xf32>
    %23 = vector.shape_cast %19 : vector<1x256xi1> to vector<1x256xi1>
    %24 = vector.broadcast %23 : vector<1x256xi1> to vector<8x256xi1>
    %25 = arith.select %24, %0, %22 : vector<8x256xi1>, vector<8x256xf32>
    %26 = arith.maximumf %0, %25 : vector<8x256xf32>
    %c240_i32_4 = arith.constant 240 : i32
    %27 = tpu.dynamic_rotate %26 by %c240_i32_4 dim 1 : vector<8x256xf32>, i32 -> vector<8x256xf32>
    %28 = vector.shape_cast %21 : vector<1x256xi1> to vector<1x256xi1>
    %29 = vector.broadcast %28 : vector<1x256xi1> to vector<8x256xi1>
    %30 = arith.select %29, %26, %27 : vector<8x256xi1>, vector<8x256xf32>
    %31 = arith.maximumf %26, %30 : vector<8x256xf32>
    %c0_5 = arith.constant 0 : index
    %c0_6 = arith.constant 0 : index
    %32 = vector.load %arg2[%c0_5, %c0_6] : memref<8x256xf32, #tpu.memory_space<vmem>>, vector<8x256xf32>
    tpu.vector_store %arg2[%c0_5, %c0_6], %31 {strides = array<i32>} : memref<8x256xf32, #tpu.memory_space<vmem>>, vector<8x256xf32>,
    return
  }
  func.func @transform_0(%arg0: i32) -> (i32, i32) {
    %c0_i32 = arith.constant 0 : i32
    %c0_i32_0 = arith.constant 0 : i32
    return %arg0, %c0_i32 : i32, i32
  }
  func.func @transform_1(%arg0: i32) -> (i32, i32) {
    %c0_i32 = arith.constant 0 : i32
    %c0_i32_0 = arith.constant 0 : i32
    return %arg0, %c0_i32 : i32, i32
  }
}

</mosaic_0001>

<bundles_post_ra>
// kernel: tpu_custom_call.1
= control target key start
LH: loop header
LB: loop body
LE: loop exit
PB: predicated region body
PF: predicated region fallthrough
CT: control target
= control target key end

     0   :  { %6 = vsyncpa [#allocation3], 0  ;;  %s169_s0 = inlined_call_operand.hbm [shape: f32[8,256], index: 0, kind: input, shape index: {}]   ;;  %s170_s1 = inlined_call_operand.hbm [shape: f32[8,256], index: 1, kind: output, shape index: {}]  }
   0x1   :  { %7 = vsyncpa [#allocation4], 0  ;;  %s149_s6 = smov [#allocation2]  }
   0x2   :  { %s14_s7 = sshll.u32 %s149_s6, 4  ;;  %s15_s7 = int_to_ptr.vmem [resolvable:$true] %s14_s7 }
   0x3   :  { %s113_s8 = scalar_lea.vmem %s15_s7, 256  ;;  %p118_p1 = scmp.lt.s32.totalorder %s15_s7, %s15_s7 }
   0x4   :  { %p114_p0 = scmp.ne.s32.totalorder %s15_s7, %s113_s8  ;;  %p119_p2 = scmp.lt.s32.totalorder %s113_s8, %s113_s8 }
   0x6   :  { %p120_p3 = por %p119_p2, %p118_p1 }
   0x8   :  { %p121_p4 = pnand %p120_p3, %p114_p0 }
   0xa   :  { %124 = shalt.err (!%p121_p4)
}
   0xb   :  { %17 = dma.hbm_to_vmem [thread:$0]  %s169_s0, 256, %s15_s7, [#allocation3]  }
   0xc   :  { %145 = dma.done.wait [#allocation3], 256  }
   0xd   :  { %146 = vsyncadd [#allocation3], 4294967040  ;;  %v21_v0 = vld [vmem:[#allocation2] sm:$0xff]  ;;  %s150_s11 = smov 127   ;;  %v22_v1 = vld [vmem:[#allocation2 + $0x8] sm:$0xff]  ;;  %v23_v2 = vlaneseq  ;;  %s151_s0 = smov 112  }
   0xe   :  { %54 = vrot.lane.b32.xlu0 %v21_v0, %s150_s11  ;;  %s152_s12 = smov [#allocation5]  }
   0xf   :  { %v24_v3 = vand.u32 127, %v23_v2  ;;  %s92_s13 = sshll.u32 %s152_s12, 4  ;;  %s93_s13 = int_to_ptr.vmem [resolvable:$true] %s92_s13 }
  0x10   :  { %s125_s14 = scalar_lea.vmem %s93_s13, 256  ;;  %p130_p6 = scmp.lt.s32.totalorder %s93_s13, %s93_s13 }
  0x11   :  { %v25_v4 = vadd.s32 128, %v24_v3  ;;  %v30_v5 = vand.u32 15, %v24_v3  ;;  %vm58_vm0 = vcmp.lt.s32.totalorder %v24_v3, 127  ;;  %vm73_vm3 = vcmp.lt.s32.totalorder %v24_v3, 112  ;;  %p126_p5 = scmp.ne.s32.totalorder %s93_s13, %s125_s14  ;;  %p131_p7 = scmp.lt.s32.totalorder %s125_s14, %s125_s14 }
  0x12   :  { %56 = vrot.lane.b32.xlu0 %v22_v1, %s150_s11 }
  0x13   :  { %v37_v7 = vand.u32 15, %v25_v4  ;;  %vm50_vm1 = vcmp.eq.s32.totalorder %v30_v5, 15  ;;  %vm53_vm4 = vcmp.ge.s32.totalorder %v25_v4, 240  ;;  %p132_p8 = por %p131_p7, %p130_p6 }
  0x15   :  { %vm51_vm2 = vcmp.eq.s32.totalorder %v37_v7, 15  ;;  %p133_p9 = pnand %p132_p8, %p126_p5 }
  0x80   :  { %v55_v6 = vpop.permute.xlu0 %54 }
  0x84   :  { %v57_v8 = vpop.permute.xlu0 %56 }
  0x85   :  { %v59_v9 = vsel %vm58_vm0, %v55_v6, %v57_v8  ;;  %v60_v10 = vsel %vm58_vm0, %v57_v8, %v55_v6 }
  0x86   :  { %v65_v11 = vsel %vm50_vm1, %v21_v0, %v59_v9  ;;  %v66_v13 = vsel %vm51_vm2, %v22_v1, %v60_v10 }
  0x87   :  { %v67_v12 = vmax.f32 %v21_v0, %v65_v11  ;;  %v68_v14 = vmax.f32 %v22_v1, %v66_v13 }
  0x89   :  { %69 = vrot.lane.b32.xlu1 %v67_v12, %s151_s0 }
  0x8d   :  { %71 = vrot.lane.b32.xlu1 %v68_v14, %s151_s0 }
  0xfb   :  { %v70_v15 = vpop.permute.xlu1 %69 }
  0xff   :  { %v72_v16 = vpop.permute.xlu1 %71 }
 0x100   :  { %v74_v17 = vsel %vm73_vm3, %v70_v15, %v72_v16  ;;  %v75_v18 = vsel %vm73_vm3, %v72_v16, %v70_v15 }
 0x101   :  { %v81_v19 = vsel %vm53_vm4, %v68_v14, %v75_v18  ;;  %v82_v20 = vmax.f32 %v67_v12, %v74_v17 }
 0x102   :  { %v83_v21 = vmax.f32 %v68_v14, %v81_v19 }
 0x103   :  { %84 = vst [vmem:[#allocation5] sm:$0xff] %v82_v20 }
 0x104   :  { %85 = vst [vmem:[#allocation5 + $0x8] sm:$0xff] %v83_v21 }
 0x105   :  { %136 = shalt.err (!%p133_p9)
}
 0x106   :  { %95 = dma.vmem_to_hbm [thread:$0]  %s93_s13, 256, %s170_s1, [#allocation4]  }
 0x107   :  { %147 = dma.done.wait [#allocation4], 256  }
 0x108   :  { %148 = vsyncadd [#allocation4], 4294967040 }
 0x109   :  { %99 = vsyncpa [#allocation3], 1 }
 0x10a   :  { %100 = vsyncpa [#allocation4], 1 }

</bundles_post_ra>
